<compile_context>
chip_gen: v7x
topology: tpu7x:2x2x1
jax: 0.10.0
libtpu: 0.0.40
codegen_flags: <defaults>
</compile_context>

<pallas_src>
import functools

import jax
import jax.numpy as jnp
from jax import lax
from jax.experimental import pallas as pl
from jax.experimental.pallas import tpu as pltpu


def _addnorm_kernel(seed_ref, res_ref, cur_ref, w_ref, b_ref, out_ref, *,
                    dropout_p: float, eps: float, training: bool,
                    use_hw_prng: bool):
    res = res_ref[...]                       # (TM, H), I/O dtype
    cur = cur_ref[...]                       # (TM, H), I/O dtype
    tm, h = cur.shape

    if training and dropout_p > 0.0:
        if use_hw_prng:
            # Hardware PRNG: one dedicated instruction per vreg instead of
            # ~15 VPU integer ops per element.  Per-tile decorrelation via the
            # grid index mixed into the seed.
            pltpu.prng_seed(seed_ref[0] + pl.program_id(0))
            bits = pltpu.bitcast(pltpu.prng_random_bits((tm, h)), jnp.uint32)
        else:
            # Fallback (interpret mode / non-TPU backend): stateless
            # counter-based hash (murmur3 fmix32) on the global element index.
            seed = seed_ref[0].astype(jnp.uint32)
            row0 = pl.program_id(0).astype(jnp.uint32) * jnp.uint32(tm)
            r = lax.broadcasted_iota(jnp.uint32, (tm, h), 0)
            c = lax.broadcasted_iota(jnp.uint32, (tm, h), 1)
            bits = (row0 + r) * jnp.uint32(h) + c
            bits = bits ^ (seed * jnp.uint32(0x9E3779B9))
            bits = bits ^ (bits >> jnp.uint32(16))
            bits = bits * jnp.uint32(0x85EBCA6B)
            bits = bits ^ (bits >> jnp.uint32(13))
            bits = bits * jnp.uint32(0xC2B2AE35)
            bits = bits ^ (bits >> jnp.uint32(16))
        # Integer threshold:  P(keep) = 1 - p
        thresh = jnp.uint32(min(int(round(dropout_p * (2.0 ** 32))), 2 ** 32 - 1))
        keep = bits >= thresh
        scale = jnp.asarray(1.0 / (1.0 - dropout_p), dtype=cur.dtype)
        cur = jnp.where(keep, cur * scale, jnp.zeros((), cur.dtype))

    # Residual add in the I/O dtype (matches torch; bf16 stays packed on the
    # VPU for v6e/v7x).  Statistics run in f32.
    x = res + cur
    xf = x.astype(jnp.float32)

    # Single-pass moments over the hidden axis (f32).
    inv_h = jnp.float32(1.0 / h)
    mean = jnp.sum(xf, axis=-1, keepdims=True) * inv_h
    ex2 = jnp.sum(xf * xf, axis=-1, keepdims=True) * inv_h
    var = jnp.maximum(ex2 - mean * mean, jnp.float32(0.0))   # clamp for safety
    inv = lax.rsqrt(var + jnp.float32(eps))

    # Folded affine: out = x*(inv*w) + (b - mean*inv*w)
    w = w_ref[...].astype(jnp.float32)       # (1, H) broadcast
    b = b_ref[...].astype(jnp.float32)
    scale_row = inv * w                      # (TM, H)
    shift_row = b - mean * scale_row         # (TM, H)
    # NOTE: if rows % TM != 0, padded rows in the last tile compute rsqrt on
    # padding data; their stores are masked so the output is unaffected.
    out_ref[...] = (xf * scale_row + shift_row).astype(out_ref.dtype)


def add_norm(residual_x, current_x, weight, bias, *, seed=0,
             dropout_p=0.2, eps=1e-5, training=True, block_rows=None):
    """AddNorm forward: LayerNorm(residual_x + Dropout(current_x))."""
    assert residual_x.shape == current_x.shape
    orig_shape = residual_x.shape
    H = orig_shape[-1]
    rows = 1
    for d in orig_shape[:-1]:
        rows *= d

    res2d = residual_x.reshape(rows, H)
    cur2d = current_x.reshape(rows, H)
    w2d = weight.reshape(1, H)
    b2d = bias.reshape(1, H)
    seed_arr = jnp.asarray([seed], dtype=jnp.int32)

    itemsize = jnp.dtype(residual_x.dtype).itemsize

    # Generation-aware VMEM capacity (v5e/v6e: 128 MiB; v7x: 64 MiB per TC).
    default_cap = 64 * 1024 * 1024
    try:
        info = pltpu.get_tpu_info()
        vmem_cap = int(getattr(info, "vmem_capacity_bytes", default_cap))
    except Exception:
        vmem_cap = default_cap

    # Live bytes per (row, hidden) element:
    #   3 I/O streams x 2 (double-buffered) in the I/O dtype
    # + ~3 f32 in-kernel intermediates (x_f32, scale_row, shift_row).
    per_elem = 6 * itemsize + 12

    if block_rows is None:
        budget = int(vmem_cap * 0.6)          # leave headroom for compiler scratch
        tm = budget // (per_elem * H)
        tm = max(8, min(int(tm), 2048))
        tm = (tm // 8) * 8
        block_rows = min(tm, rows)
        # Guarantee >= 2 grid tiles so the "parallel" row axis can be sharded
        # across v7x's two TensorCores (no effect on single-TC v5e/v6e).
        if rows >= 16:
            half = max(8, (pl.cdiv(rows, 2) // 8) * 8)
            block_rows = min(block_rows, half)
        block_rows = max(8, (block_rows // 8) * 8)
    TM = int(block_rows)

    num_tiles = pl.cdiv(rows, TM)

    needed = per_elem * TM * H + 4 * (1 << 20)
    vmem_limit = int(min(int(vmem_cap * 0.9), max(needed, 16 * 1024 * 1024)))

    use_hw_prng = jax.default_backend() == "tpu"

    kernel = functools.partial(_addnorm_kernel,
                               dropout_p=float(dropout_p),
                               eps=float(eps),
                               training=bool(training),
                               use_hw_prng=bool(use_hw_prng))

    grid_spec = pltpu.PrefetchScalarGridSpec(
        num_scalar_prefetch=1,                 # seed lands in SMEM
        grid=(num_tiles,),
        in_specs=[
            pl.BlockSpec((TM, H), lambda i, seed: (i, 0)),   # residual tile
            pl.BlockSpec((TM, H), lambda i, seed: (i, 0)),   # current tile
            pl.BlockSpec((1, H), lambda i, seed: (0, 0)),    # ln weight
            pl.BlockSpec((1, H), lambda i, seed: (0, 0)),    # ln bias
        ],
        out_specs=pl.BlockSpec((TM, H), lambda i, seed: (i, 0)),
    )

    out2d = pl.pallas_call(
        kernel,
        out_shape=jax.ShapeDtypeStruct((rows, H), residual_x.dtype),
        grid_spec=grid_spec,
        compiler_params=pltpu.CompilerParams(
            dimension_semantics=("parallel",),   # independent rows -> megacore
            vmem_limit_bytes=vmem_limit),
    )(seed_arr, res2d, cur2d, w2d, b2d)

    return out2d.reshape(orig_shape)


def add_norm_ref_no_dropout(residual_x, current_x, weight, bias, eps=1e-5):
    x = residual_x + current_x
    mean = jnp.mean(x, axis=-1, keepdims=True)
    var = jnp.mean((x - mean) ** 2, axis=-1, keepdims=True)
    y = (x - mean) / jnp.sqrt(var + eps)
    return y * weight + bias


if __name__ == "__main__":
    # ---- small demo shape implied by the module: (batch, seq, hidden) ----
    B, S, H = 2, 8, 32          # enter_shape = [H]
    key = jax.random.PRNGKey(0)
    k1, k2, k3, k4 = jax.random.split(key, 4)

    residual_x = jax.random.normal(k1, (B, S, H), dtype=jnp.float32)
    current_x = jax.random.normal(k2, (B, S, H), dtype=jnp.float32)

    # PyTorch LayerNorm default init: weight = ones, bias = zeros.
    weight = jnp.ones((H,), dtype=jnp.float32)
    bias = jnp.zeros((H,), dtype=jnp.float32)

    # Training-mode forward (dropout active, seeded, deterministic).
    out_train = add_norm(residual_x, current_x, weight, bias,
                         seed=0, dropout_p=0.2, training=True)
    jax.block_until_ready(out_train)

    # Eval-mode forward (dropout = identity) checked against a pure-JAX ref.
    out_eval = add_norm(residual_x, current_x, weight, bias,
                        seed=0, dropout_p=0.2, training=False)
    ref_eval = add_norm_ref_no_dropout(residual_x, current_x, weight, bias)
    jax.block_until_ready(out_eval)

    assert out_train.shape == (B, S, H)
    assert bool(jnp.all(jnp.isfinite(out_train)))
    assert bool(jnp.allclose(out_eval, ref_eval, atol=1e-4, rtol=1e-5))
    # Dropout actually changed something in training mode.
    assert not bool(jnp.allclose(out_train, out_eval, atol=1e-5, rtol=1e-5))

    # ---- larger, lane-dense, multi-tile check (exercises the grid) ----
    B2, S2, H2 = 4, 512, 128    # rows = 2048, forced into 4 tiles of 512 rows
    r2 = jax.random.normal(k3, (B2, S2, H2), dtype=jnp.float32)
    c2 = jax.random.normal(k4, (B2, S2, H2), dtype=jnp.float32)
    w2 = jnp.ones((H2,), dtype=jnp.float32)
    b2 = jnp.zeros((H2,), dtype=jnp.float32)

    out2_eval = add_norm(r2, c2, w2, b2, seed=3, dropout_p=0.2,
                         training=False, block_rows=512)
    ref2_eval = add_norm_ref_no_dropout(r2, c2, w2, b2)
    out2_train = add_norm(r2, c2, w2, b2, seed=3, dropout_p=0.2,
                          training=True, block_rows=512)
    jax.block_until_ready((out2_eval, out2_train))

    assert bool(jnp.allclose(out2_eval, ref2_eval, atol=1e-4, rtol=1e-5))
    assert bool(jnp.all(jnp.isfinite(out2_train)))

    # ---- bf16 path with auto tile sizing (exercises VMEM accounting) ----
    r3 = r2.astype(jnp.bfloat16)
    c3 = c2.astype(jnp.bfloat16)
    out3 = add_norm(r3, c3, w2.astype(jnp.bfloat16), b2.astype(jnp.bfloat16),
                    seed=7, dropout_p=0.2, training=True)
    jax.block_until_ready(out3)
    assert out3.dtype == jnp.bfloat16
    assert bool(jnp.all(jnp.isfinite(out3.astype(jnp.float32))))

    print("KERNEL_OK")
</pallas_src>

<mosaic_0001>
module attributes {stable_mosaic.version = 11 : i64} {
  func.func @_addnorm_kernel(%arg0: i32, %arg1: memref<1xi32, #tpu.memory_space<smem>>, %arg2: memref<8x32xf32, #tpu.memory_space<vmem>>, %arg3: memref<8x32xf32, #tpu.memory_space<vmem>>, %arg4: memref<1x32xf32, #tpu.memory_space<vmem>>, %arg5: memref<1x32xf32, #tpu.memory_space<vmem>>, %arg6: memref<8x32xf32, #tpu.memory_space<vmem>>) attributes {dimension_semantics = [#tpu.dimension_semantics<parallel>], iteration_bounds = array<i64: 2>, scalar_prefetch = 1 : i64, scratch_operands = 0 : i64, tpu.core_type = #tpu.core_type<tc>, window_params = [{transform_indices = @transform_0, window_bounds = array<i64: 8, 32>}, {transform_indices = @transform_1, window_bounds = array<i64: 8, 32>}, {pipeline_mode = #tpu.pipeline_mode<synchronous>, transform_indices = @transform_2, window_bounds = array<i64: 1, 32>}, {pipeline_mode = #tpu.pipeline_mode<synchronous>, transform_indices = @transform_3, window_bounds = array<i64: 1, 32>}, {transform_indices = @transform_4, window_bounds = array<i64: 8, 32>}]} {
    %c0 = arith.constant 0 : index
    %c0_0 = arith.constant 0 : index
    %0 = vector.load %arg2[%c0, %c0_0] : memref<8x32xf32, #tpu.memory_space<vmem>>, vector<8x32xf32>
    %c0_1 = arith.constant 0 : index
    %c0_2 = arith.constant 0 : index
    %1 = vector.load %arg3[%c0_1, %c0_2] : memref<8x32xf32, #tpu.memory_space<vmem>>, vector<8x32xf32>
    %c0_3 = arith.constant 0 : index
    %2 = memref.load %arg1[%c0_3] : memref<1xi32, #tpu.memory_space<smem>>
    %c8_i32 = arith.constant 8 : i32
    %3 = arith.muli %arg0, %c8_i32 : i32
    %4 = tpu.iota {dimensions = array<i32: 0>} : vector<8x32xi32>
    %5 = tpu.iota {dimensions = array<i32: 1>} : vector<8x32xi32>
    %6 = vector.broadcast %3 : i32 to vector<8x32xi32>
    %7 = arith.addi %6, %4 : vector<8x32xi32>
    %c32_i32 = arith.constant 32 : i32
    %8 = vector.broadcast %c32_i32 : i32 to vector<8x32xi32>
    %9 = arith.muli %7, %8 : vector<8x32xi32>
    %10 = arith.addi %9, %5 : vector<8x32xi32>
    %c-1640531527_i32 = arith.constant -1640531527 : i32
    %11 = arith.muli %2, %c-1640531527_i32 : i32
    %12 = vector.broadcast %11 : i32 to vector<8x32xi32>
    %13 = arith.xori %10, %12 : vector<8x32xi32>
    %c16_i32 = arith.constant 16 : i32
    %14 = vector.broadcast %c16_i32 : i32 to vector<8x32xi32>
    %15 = arith.shrui %13, %14 : vector<8x32xi32>
    %16 = arith.xori %13, %15 : vector<8x32xi32>
    %c-2048144789_i32 = arith.constant -2048144789 : i32
    %17 = vector.broadcast %c-2048144789_i32 : i32 to vector<8x32xi32>
    %18 = arith.muli %16, %17 : vector<8x32xi32>
    %c13_i32 = arith.constant 13 : i32
    %19 = vector.broadcast %c13_i32 : i32 to vector<8x32xi32>
    %20 = arith.shrui %18, %19 : vector<8x32xi32>
    %21 = arith.xori %18, %20 : vector<8x32xi32>
    %c-1028477387_i32 = arith.constant -1028477387 : i32
    %22 = vector.broadcast %c-1028477387_i32 : i32 to vector<8x32xi32>
    %23 = arith.muli %21, %22 : vector<8x32xi32>
    %c16_i32_4 = arith.constant 16 : i32
    %24 = vector.broadcast %c16_i32_4 : i32 to vector<8x32xi32>
    %25 = arith.shrui %23, %24 : vector<8x32xi32>
    %26 = arith.xori %23, %25 : vector<8x32xi32>
    %c858993459_i32 = arith.constant 858993459 : i32
    %27 = vector.broadcast %c858993459_i32 : i32 to vector<8x32xi32>
    %28 = arith.cmpi uge, %26, %27 : vector<8x32xi32>
    %cst = arith.constant 1.250000e+00 : f32
    %29 = vector.broadcast %cst : f32 to vector<8x32xf32>
    %30 = arith.mulf %1, %29 : vector<8x32xf32>
    %cst_5 = arith.constant 0.000000e+00 : f32
    %31 = vector.broadcast %cst_5 : f32 to vector<8x32xf32>
    %32 = arith.select %28, %30, %31 : vector<8x32xi1>, vector<8x32xf32>
    %33 = arith.addf %0, %32 : vector<8x32xf32>
    %cst_6 = arith.constant dense<0.000000e+00> : vector<8xf32>
    %34 = vector.multi_reduction <add>, %33, %cst_6 [1] : vector<8x32xf32> to vector<8xf32>
    %35 = vector.shape_cast %34 : vector<8xf32> to vector<8x1xf32>
    %cst_7 = arith.constant 3.125000e-02 : f32
    %36 = vector.broadcast %cst_7 : f32 to vector<8x1xf32>
    %37 = arith.mulf %35, %36 : vector<8x1xf32>
    %38 = arith.mulf %33, %33 : vector<8x32xf32>
    %cst_8 = arith.constant dense<0.000000e+00> : vector<8xf32>
    %39 = vector.multi_reduction <add>, %38, %cst_8 [1] : vector<8x32xf32> to vector<8xf32>
    %40 = vector.shape_cast %39 : vector<8xf32> to vector<8x1xf32>
    %cst_9 = arith.constant 3.125000e-02 : f32
    %41 = vector.broadcast %cst_9 : f32 to vector<8x1xf32>
    %42 = arith.mulf %40, %41 : vector<8x1xf32>
    %43 = arith.mulf %37, %37 : vector<8x1xf32>
    %44 = arith.subf %42, %43 : vector<8x1xf32>
    %cst_10 = arith.constant 0.000000e+00 : f32
    %45 = vector.broadcast %cst_10 : f32 to vector<8x1xf32>
    %46 = arith.maximumf %44, %45 : vector<8x1xf32>
    %cst_11 = arith.constant 9.99999974E-6 : f32
    %47 = vector.broadcast %cst_11 : f32 to vector<8x1xf32>
    %48 = arith.addf %46, %47 : vector<8x1xf32>
    %49 = math.rsqrt %48 : vector<8x1xf32>
    %c0_12 = arith.constant 0 : index
    %c0_13 = arith.constant 0 : index
    %50 = vector.load %arg4[%c0_12, %c0_13] : memref<1x32xf32, #tpu.memory_space<vmem>>, vector<1x32xf32>
    %c0_14 = arith.constant 0 : index
    %c0_15 = arith.constant 0 : index
    %51 = vector.load %arg5[%c0_14, %c0_15] : memref<1x32xf32, #tpu.memory_space<vmem>>, vector<1x32xf32>
    %52 = vector.broadcast %49 : vector<8x1xf32> to vector<8x32xf32>
    %53 = vector.broadcast %50 : vector<1x32xf32> to vector<8x32xf32>
    %54 = arith.mulf %52, %53 : vector<8x32xf32>
    %55 = vector.broadcast %37 : vector<8x1xf32> to vector<8x32xf32>
    %56 = arith.mulf %55, %54 : vector<8x32xf32>
    %57 = vector.broadcast %51 : vector<1x32xf32> to vector<8x32xf32>
    %58 = arith.subf %57, %56 : vector<8x32xf32>
    %59 = arith.mulf %33, %54 : vector<8x32xf32>
    %60 = arith.addf %59, %58 : vector<8x32xf32>
    %c0_16 = arith.constant 0 : index
    %c0_17 = arith.constant 0 : index
    %61 = vector.load %arg6[%c0_16, %c0_17] : memref<8x32xf32, #tpu.memory_space<vmem>>, vector<8x32xf32>
    tpu.vector_store %arg6[%c0_16, %c0_17], %60 {strides = array<i32>} : memref<8x32xf32, #tpu.memory_space<vmem>>, vector<8x32xf32>,
    return
  }
  func.func @transform_0(%arg0: i32, %arg1: memref<1xi32, #tpu.memory_space<smem>>) -> (i32, i32) {
    %c0_i32 = arith.constant 0 : i32
    %c0_i32_0 = arith.constant 0 : i32
    return %arg0, %c0_i32 : i32, i32
  }
  func.func @transform_1(%arg0: i32, %arg1: memref<1xi32, #tpu.memory_space<smem>>) -> (i32, i32) {
    %c0_i32 = arith.constant 0 : i32
    %c0_i32_0 = arith.constant 0 : i32
    return %arg0, %c0_i32 : i32, i32
  }
  func.func @transform_2(%arg0: i32, %arg1: memref<1xi32, #tpu.memory_space<smem>>) -> (i32, i32) {
    %c0_i32 = arith.constant 0 : i32
    %c0_i32_0 = arith.constant 0 : i32
    %c0_i32_1 = arith.constant 0 : i32
    return %c0_i32, %c0_i32_0 : i32, i32
  }
  func.func @transform_3(%arg0: i32, %arg1: memref<1xi32, #tpu.memory_space<smem>>) -> (i32, i32) {
    %c0_i32 = arith.constant 0 : i32
    %c0_i32_0 = arith.constant 0 : i32
    %c0_i32_1 = arith.constant 0 : i32
    return %c0_i32, %c0_i32_0 : i32, i32
  }
  func.func @transform_4(%arg0: i32, %arg1: memref<1xi32, #tpu.memory_space<smem>>) -> (i32, i32) {
    %c0_i32 = arith.constant 0 : i32
    %c0_i32_0 = arith.constant 0 : i32
    return %arg0, %c0_i32 : i32, i32
  }
}

</mosaic_0001>

<bundles_post_ra>
// kernel: tpu_custom_call.1
= control target key start
LH: loop header
LB: loop body
LE: loop exit
PB: predicated region body
PF: predicated region fallthrough
CT: control target
= control target key end

     0   :  { %s884_s0 = inlined_call_operand.<no memory space> [shape: s32[1], index: 0, kind: input, shape index: {}]   ;;  %s885_s1 = inlined_call_operand.hbm [shape: f32[16,32], index: 1, kind: input, shape index: {}]   ;;  %s886_s2 = inlined_call_operand.hbm [shape: f32[16,32], index: 2, kind: input, shape index: {}]   ;;  %s887_s3 = inlined_call_operand.vmem [shape: f32[1,32], index: 3, kind: input, shape index: {}]   ;;  %s888_s4 = inlined_call_operand.vmem [shape: f32[1,32], index: 4, kind: input, shape index: {}]   ;;  %s889_s5 = inlined_call_operand.hbm [shape: f32[16,32], index: 5, kind: output, shape index: {}]  }
   0x1   :  { %10 = sst [smem:[#allocation3]] %s884_s0 }
   0x2   :  { %11 = vsyncpa [#allocation5], 0 }
   0x3   :  { %13 = vsyncpa [#allocation5 + $0x1], 0 }
   0x4   :  { %14 = vsyncpa [#allocation8], 0 }
   0x5   :  { %16 = vsyncpa [#allocation8 + $0x1], 0 }
   0x6   :  { %17 = vsyncpa [#allocation6], 0 }
   0x7   :  { %19 = vsyncpa [#allocation6 + $0x1], 0  ;;  %s660_s20 = smov 0   ;;  %s662_s21 = smov 0  }
   0x8   :  { %s664_s22 = smov 0   ;;  %s666_s23 = smov 0  }
   0x9 LB: > { %s681_s0 = sadd.s32 4294967295, %s622_s23   ;;  %s421_s24 = sadd.s32 4294967294, %s622_s23   ;;  %s622_s23 = sphi %s666_s23, %s908_s23   ;;  %s618_s22 = sphi %s664_s22, %s907_s22   ;;  %s614_s21 = sphi %s662_s21, %s906_s21   ;;  %s610_s20 = sphi %s660_s20, %s905_s20  }
   0xa   : > { %s685_s25 = sadd.s32 1, %s622_s23   ;;  %s32_s26 = sadd.s32 1, %s618_s22 }
   0xb   : > { %s29_s27 = ssub.s32 %s622_s23, %s685_s25  ;;  %p39_p0 = scmp.ne.s32.totalorder %s618_s22, %s614_s21 }
   0xc   : > { %p30_p1 = scmp.eq.s32.totalorder %s29_s27, 0  ;;  %p40_p2 = scmp.eq.s32.totalorder %s622_s23, 0 }
   0xd   : > { %p45_p3 = scmp.ne.s32.totalorder %s614_s21, %s610_s20  ;;  %p46_p4 = scmp.eq.s32.totalorder %s681_s0, 0 }
   0xe   : > { %s697_s28 = scalar_select %p30_p1, %s618_s22, %s32_s26  }
   0xf   : > { %p699_p5 = por %p40_p2, %p39_p0  ;;  %p703_p6 = por %p46_p4, %p45_p3 }
  0x10   : > { %p137_p7 = scmp.eq.s32.totalorder %s681_s0, 1  ;;  %p143_p8 = scmp.eq.s32.totalorder %s421_s24, 1 }
  0x11   : > { %s893_s30 = scalar_select %p703_p6, 1, 0 }
  0x12   : > { %p456_p10 = scmp.lt.s32.totalorder %s622_s23, 2  ;;  %p710_p11 = por %p137_p7, %p39_p0 }
  0x13   : > { %p714_p12 = por %p143_p8, %p45_p3  ;;  %s719_s8 = sand.u32 1, %s618_s22  }
  0x14   : > { %s894_s6 = scalar_select %p710_p11, 1, 0 }
  0x15   : > { %s895_s7 = scalar_select %p714_p12, 1, 0 }
  0x16   : > { %s425_s9 = sshll.u32 %s622_s23, 7  ;;  %s424_s10 = sshll.u32 %s719_s8, 3 }
  0x17   : > { %s728_s13 = scalar_lea.hbm %s885_s1, %s425_s9  ;;  %s173_s14 = scalar_lea.vmem [#allocation4], %s424_s10 }
  0x18   : > { %s180_s15 = sshll.u32 %s173_s14, 4  ;;  %p734_p13 = pnand %p456_p10, %p699_p5  ;;  %s738_s15 = int_to_ptr.vmem [resolvable:$true] %s180_s15 }
  0x19   : > { %s170_s17 = scalar_lea.sflag [#allocation5], %s719_s8  ;;  %s492_s18 = scalar_lea.hbm %s728_s13, 128 }
  0x1a   : > { %p493_p2 = scmp.ne.s32.totalorder %s728_s13, %s492_s18  ;;  %p494_p3 = pneg %p734_p13 }
  0x1b   : > { %s497_s26 = scalar_lea.hbm %s885_s1, 256  ;;  %p498_p5 = scmp.lt.u32.totalorder %s728_s13, %s885_s1 }
  0x1c   : > { %p495_p4 = pnand %p494_p3, %p493_p2  ;;  %p499_p8 = scmp.lt.u32.totalorder %s497_s26, %s492_s18 }
  0x1d   : > { %p501_p9 = scmp.lt.u32.totalorder %s492_s18, %s728_s13 }
  0x1e   : > { %p496_p7 = pneg %p495_p4  ;;  %p500_p10 = por %p499_p8, %p498_p5 }
  0x20   : > { %p502_p0 = por %p501_p9, %p500_p10 }
  0x22   : > { %p503_p1 = pnand %p502_p0, %p496_p7 }
  0x24   : > { %506 = shalt.err (!%p503_p1)
}
  0x25   : > { %s507_s11 = scalar_lea.vmem %s738_s15, 128  ;;  %s624_s12 = smov [#allocation4]  }
  0x26   : > { %p508_p2 = scmp.ne.s32.totalorder %s738_s15, %s507_s11  ;;  %s512_s14 = sshll.u32 %s624_s12, 4  ;;  %s513_s14 = int_to_ptr.vmem [resolvable:$false] %s512_s14 }
  0x27   : > { %s514_s19 = scalar_lea.vmem %s513_s14, 256  ;;  %p515_p11 = scmp.lt.s32.totalorder %s738_s15, %s513_s14 }
  0x28   : > { %p510_p4 = pnand %p508_p2, %p494_p3  ;;  %p516_p5 = scmp.lt.s32.totalorder %s514_s19, %s507_s11 }
  0x2a   : > { %p511_p12 = pneg %p510_p4  ;;  %p517_p8 = por %p516_p5, %p515_p11 }
  0x2c   : > { %p518_p9 = pnand %p517_p8, %p511_p12 }
  0x2e   : > { %521 = shalt.err (!%p518_p9)
}
  0x2f   : > { %448 = dma.hbm_to_vmem [thread:$0]  (!%p734_p13), %s728_s13, 128, %s738_s15, %s170_s17  }
  0x30   : > { %p897_p0 = scmp.lt.s32.totalorder %s622_s23, 3  ;;  %p898_p1 = scmp.ge.s32.totalorder %s622_s23, 1 }
  0x31   : > { %s781_s27 = scalar_lea.hbm %s886_s2, %s425_s9  ;;  %s191_s29 = scalar_lea.vmem [#allocation7], %s424_s10 }
  0x32   : > { %p772_p7 = pnand %p898_p1, %p897_p0  ;;  %s198_s11 = sshll.u32 %s191_s29, 4  ;;  %s199_s11 = int_to_ptr.vmem [resolvable:$true] %s198_s11 }
  0x33   : > { %s188_s13 = scalar_lea.sflag [#allocation8], %s719_s8  ;;  %s522_s15 = scalar_lea.hbm %s781_s27, 128 }
  0x34   : > { %s899_s18 = scalar_select %p772_p7, 1, 0 }
  0x35   : > { %p523_p11 = scmp.ne.s32.totalorder %s781_s27, %s522_s15  ;;  %s527_s9 = scalar_lea.hbm %s886_s2, 256 }
  0x36   : > { %p528_p2 = scmp.lt.u32.totalorder %s781_s27, %s886_s2  ;;  %p529_p4 = scmp.lt.u32.totalorder %s527_s9, %s522_s15 }
  0x37   : > { %p525_p12 = pnand %p523_p11, %p494_p3  ;;  %p531_p8 = scmp.lt.u32.totalorder %s522_s15, %s781_s27 }
  0x38   : > { %p530_p5 = por %p529_p4, %p528_p2 }
  0x39   : > { %p526_p10 = pneg %p525_p12 }
  0x3a   : > { %p532_p9 = por %p531_p8, %p530_p5 }
  0x3c   : > { %p533_p0 = pnand %p532_p9, %p526_p10 }
  0x3e   : > { %536 = shalt.err (!%p533_p0)
}
  0x3f   : > { %s537_s8 = scalar_lea.vmem %s199_s11, 128  ;;  %s625_s10 = smov [#allocation7]  }
  0x40   : > { %p538_p1 = scmp.ne.s32.totalorder %s199_s11, %s537_s8  ;;  %s542_s24 = sshll.u32 %s625_s10, 4  ;;  %s543_s24 = int_to_ptr.vmem [resolvable:$false] %s542_s24 }
  0x41   : > { %s544_s26 = scalar_lea.vmem %s543_s24, 256  ;;  %p545_p6 = scmp.lt.s32.totalorder %s199_s11, %s543_s24 }
  0x42   : > { %p540_p11 = pnand %p538_p1, %p494_p3  ;;  %p546_p7 = scmp.lt.s32.totalorder %s544_s26, %s537_s8 }
  0x44   : > { %p541_p12 = pneg %p540_p11  ;;  %p547_p2 = por %p546_p7, %p545_p6 }
  0x46   : > { %p548_p4 = pnand %p547_p2, %p541_p12 }
  0x48   : > { %551 = shalt.err (!%p548_p4)
}
  0x49   : > { %451 = dma.hbm_to_vmem [thread:$0]  (!%p734_p13), %s781_s27, 128, %s199_s11, %s188_s13  }
  0x4a   : > { %p900_p10 = scmp.ne.s32.totalorder %s899_s18, 0 }
  0x4b   : > { %s808_s29 = sand.u32 (!%p900_p10), 1, %s614_s21   ;;  %p901_p6 = scmp.ne.s32.totalorder (!%p900_p10), %s893_s30, 0 }
  0x4c   : > { %207 = sbr.rel (%p900_p10) target bundleno = 306 (0x132), region = 36  ;;  %s811_s15 = sshll.u32 (!%p900_p10), %s808_s29, 3 }
  0x4d   : > { %s210_s17 = scalar_lea.sflag (!%p900_p10), [#allocation5], %s808_s29  ;;  %s213_s12 = scalar_lea.vmem (!%p900_p10), [#allocation4], %s811_s15 }
  0x53   : > { %597 = dma.done.wait (%p901_p6), %s210_s17, 128  }
  0x54   : > { %599 = vsyncadd (%p901_p6), %s210_s17, 4294967168  ;;  %s219_s16 = scalar_lea.sflag [#allocation8], %s808_s29  ;;  %s222_s18 = scalar_lea.vmem [#allocation7], %s811_s15 }
  0x55   : > { %601 = dma.done.wait (%p901_p6), %s219_s16, 128  }
  0x56   : > { %603 = vsyncadd (%p901_p6), %s219_s16, 4294967168  ;;  %s432_s27 = sshll.u32 %s681_s0, 3  ;;  %v256_v0 = vlaneseq  ;;  %s254_s11 = sld [smem:[#allocation3]]  ;;  %v253_v14 = vld [vmem:[%s222_s18] sm:$0xff]  ;;  %v252_v19 = vld [vmem:[%s213_s12] sm:$0xff]  ;;  %vm279_vm1 = vcmask 261120  }
  0x57   : > { %v260_v1 = vstv %s432_s27  ;;  %v276_v17 = vmul.f32 1.25, %v253_v14  ;;  %v433_v33 = vld [vmem:[%s887_s3] ss:$0 sm:$0xff]  ;;  %s436_s8 = sshll.u32 %s681_s0, 7  ;;  %s251_s10 = scalar_lea.vmem [#allocation9], %s811_s15 }
  0x58   : > { %v257_v2 = vshrl.u32 %v256_v0, 7  ;;  %v259_v3 = vand.u32 127, %v256_v0  ;;  %v434_v36 = vld [vmem:[%s888_s4] ss:$0 sm:$0xff]  ;;  %s328_s24 = sshll.u32 %s251_s10, 4  ;;  %s839_s12 = scalar_lea.hbm %s889_s5, %s436_s8  ;;  %s841_s24 = int_to_ptr.vmem [resolvable:$true] %s328_s24 }
  0x59   : > { %s315_s16 = scalar_lea.sflag [#allocation6], %s808_s29  ;;  %s552_s18 = scalar_lea.vmem %s841_s24, 128 }
  0x5a   : > { %v261_v4 = vadd.s32 %v260_v1, %v257_v2  ;;  %p553_p13 = scmp.ne.s32.totalorder %s841_s24, %s552_s18  ;;  %p902_p3 = scmp.ne.s32.totalorder %s894_s6, 0 }
  0x5b   : > { %s626_s0 = smov [#allocation9]  }
  0x5c   : > { %v262_v5 = vmul.u32 32, %v261_v4  ;;  %s264_s13 = smul.u32 2654435769, %s254_s11  ;;  %p554_p7 = pnand %p553_p13, %p902_p3 }
  0x5d   : > { %s556_s15 = sshll.u32 %s626_s0, 4  ;;  %s557_s15 = int_to_ptr.vmem [resolvable:$false] %s556_s15 }
  0x5e   : > { %v263_v6 = vadd.s32 %v262_v5, %v259_v3  ;;  %v265_v7 = vstv %s264_s13  ;;  %p555_p5 = pneg %p554_p7  ;;  %s558_s27 = scalar_lea.vmem %s557_s15, 256 }
  0x5f   : > { %p559_p8 = scmp.lt.s32.totalorder %s841_s24, %s557_s15  ;;  %p560_p9 = scmp.lt.s32.totalorder %s558_s27, %s552_s18 }
  0x60   : > { %v266_v8 = vxor.u32 %v265_v7, %v263_v6 }
  0x61   : > { %p561_p0 = por %p560_p9, %p559_p8 }
  0x62   : > { %v267_v9 = vshrl.u32 %v266_v8, 16 }
  0x63   : > { %p562_p1 = pnand %p561_p0, %p555_p5 }
  0x64   : > { %v268_v10 = vxor.u32 %v267_v9, %v266_v8 }
  0x66   : > { %v269_v11 = vmul.u32 2246822507, %v268_v10 }
  0x68   : > { %v270_v12 = vshrl.u32 %v269_v11, 13 }
  0x6a   : > { %v271_v13 = vxor.u32 %v270_v12, %v269_v11 }
  0x6c   : > { %v272_v15 = vmul.u32 3266489909, %v271_v13 }
  0x6e   : > { %v273_v16 = vshrl.u32 %v272_v15, 16 }
  0x70   : > { %v274_v18 = vxor.u32 %v273_v16, %v272_v15 }
  0x72   : > { %vm275_vm0 = vcmp.ge.u32.totalorder %v274_v18, 858993459 }
  0x73   : > { %v277_v20 = vsel %vm275_vm0, %v276_v17, 0.0 }
  0x74   : > { %v278_v21 = vadd.f32 %v277_v20, %v252_v19 }
  0x76   : > { %v280_v22 = vsel %vm279_vm1, %v278_v21, 0.0  ;;  %v284_v23 = vmul.f32 %v278_v21, %v278_v21 }
  0x77   : > { %281 = vadd.xlane.f32.xlu0 %v280_v22 }
  0x78   : > { %v285_v24 = vsel %vm279_vm1, %v284_v23, 0.0 }
  0x7b   : > { %286 = vadd.xlane.f32.xlu0 %v285_v24 }
 0x104   : > { %v282_v25 = vpop.xlane.xlu0 %281 }
 0x105   : > { %v283_v26 = vmul.f32 0.03125, %v282_v25 }
 0x107   : > { %v289_v28 = vmul.f32 %v283_v26, %v283_v26 }
 0x108   : > { %v287_v27 = vpop.xlane.xlu0 %286 }
 0x109   : > { %v288_v29 = vmul.f32 0.03125, %v287_v27 }
 0x10b   : > { %v290_v30 = vsub.f32 %v288_v29, %v289_v28 }
 0x10d   : > { %v291_v31 = vmax.f32 %v290_v30, 0.0 }
 0x10f   : > { %v292_v32 = vadd.f32 1e-05, %v291_v31 }
 0x111   : > { %490 = vrsqrt.f32 %v292_v32 }
 0x11b   : > { %v491_v34 = vpop.eup %490 }
 0x11c   : > { %v302_v35 = vmul.f32 %v491_v34, %v433_v33 }
 0x11e   : > { %v303_v37 = vmul.f32 %v302_v35, %v283_v26  ;;  %v311_v39 = vmul.f32 %v302_v35, %v278_v21 }
 0x120   : > { %v310_v38 = vsub.f32 %v434_v36, %v303_v37 }
 0x122   : > { %v312_v40 = vadd.f32 %v311_v39, %v310_v38 }
 0x124   : > { %313 = vst.msk [vmem:[%s251_s10] sm:$0xff] %vm279_vm1, %v312_v40 }
 0x125   : > { %565 = shalt.err (!%p562_p1)
}
 0x126   : > { %s566_s29 = scalar_lea.hbm %s839_s12, 128  ;;  %s570_s30 = scalar_lea.hbm %s889_s5, 256 }
 0x127   : > { %p567_p11 = scmp.ne.s32.totalorder %s839_s12, %s566_s29  ;;  %p571_p4 = scmp.lt.u32.totalorder %s839_s12, %s889_s5 }
 0x128   : > { %p572_p10 = scmp.lt.u32.totalorder %s570_s30, %s566_s29  ;;  %p574_p13 = scmp.lt.u32.totalorder %s566_s29, %s839_s12 }
 0x129   : > { %p568_p12 = pnand %p567_p11, %p902_p3 }
 0x12a   : > { %p573_p6 = por %p572_p10, %p571_p4 }
 0x12b   : > { %p569_p2 = pneg %p568_p12 }
 0x12c   : > { %p575_p7 = por %p574_p13, %p573_p6 }
 0x12e   : > { %p576_p5 = pnand %p575_p7, %p569_p2 }
 0x130   : > { %579 = shalt.err (!%p576_p5)
}
 0x131   : > { %443 = dma.vmem_to_hbm [thread:$0]  (%p902_p3), %s841_s24, 128, %s839_s12, %s315_s16  }
 0x132 PF: > { %s340_s19 = sand.u32 1, %s610_s20   ;;  %p903_p8 = scmp.ne.s32.totalorder %s895_s7, 0 }
 0x133   : > { %p904_p9 = scmp.ge.s32.totalorder %s622_s23, 2  ;;  %s341_s8 = scalar_lea.sflag [#allocation6], %s340_s19 }
 0x135   : > { %p453_p0 = pnand %p904_p9, %p903_p8 }
 0x137   : > { %605 = dma.done.wait (!%p453_p0), %s341_s8, 128  }
 0x138   : > { %607 = vsyncadd (!%p453_p0), %s341_s8, 4294967168  ;;  %p22_p1 = scmp.ge.s32.totalorder %s685_s25, 4   ;;  %s905_s20 = smov %s614_s21 }
 0x139   : > { %s906_s21 = smov %s618_s22  ;;  %s907_s22 = smov %s697_s28 }
 0x13a   : > { %s908_s23 = smov %s685_s25  ;;  %24 = sbr.rel (!%p22_p1) target bundleno = 9 (0x9), region = 94 }
 0x141   :  { %346 = vsyncpa [#allocation5], 1 }
 0x142   :  { %348 = vsyncpa [#allocation5 + $0x1], 1 }
 0x143   :  { %349 = vsyncpa [#allocation8], 1 }
 0x144   :  { %351 = vsyncpa [#allocation8 + $0x1], 1 }
 0x145   :  { %352 = vsyncpa [#allocation6], 1 }
 0x146   :  { %354 = vsyncpa [#allocation6 + $0x1], 1 }

</bundles_post_ra>
